<compile_context>
chip_gen: v5e
topology: v5e:2x2
jax: 0.10.0
libtpu: 0.0.40
codegen_flags: <defaults>
</compile_context>

<pallas_src>
import functools

import jax
import jax.numpy as jnp
from jax.experimental import pallas as pl
from jax.experimental.pallas import tpu as pltpu


def _expand_kernel(x_ref, pk_ref, o_ref, *, gain, precision):
    """One (batch, channel-tile) step.

    x_ref : (1, s, s, Mt, w)   rows are (j_local*h + hh), minor dim is w
    pk_ref: (s*w, s*w)         PK[s2*w + ww, W] = 1 iff W == ww*s + s2
    o_ref : (1, Mt, s*s*w)     columns are (s1*Ws + W)
    """
    s = gain
    pk = pk_ref[...]
    col_blocks = []
    for s1 in range(s):                      # s is tiny (e.g. 2) -> static
        # Lane-concat the s pieces for this s1: (Mt, s*w).  One matmul then
        # performs the whole W-interleave for the channel tile (K = s*w).
        xk = jnp.concatenate([x_ref[0, s1, s2] for s2 in range(s)], axis=-1)
        col_blocks.append(
            jnp.dot(xk, pk, precision=precision,
                    preferred_element_type=jnp.float32))
    z = jnp.concatenate(col_blocks, axis=-1)           # (Mt, s*Ws)
    o_ref[0] = z.astype(o_ref.dtype)


def _pick_channel_tile(cp, h, w, s, itemsize, budget_bytes=4 << 20):
    """Largest channel tile whose in/out blocks stay within ~budget_bytes."""
    per_chan = s * s * h * w * itemsize          # input block bytes per channel
    max_cpt = max(1, budget_bytes // per_chan)
    if max_cpt >= cp:
        return cp
    cands = [d for d in range(1, cp + 1)
             if cp % d == 0 and d <= max_cpt and (d * h) % 8 == 0]
    return max(cands) if cands else cp           # full cp is always a valid block


def expand_pallas(x, gain=2):
    b, c, h, w = x.shape
    s = gain
    assert c % (s * s) == 0, "channels must be divisible by gain**2"
    cp = c // (s * s)
    Hs, Ws = h * s, w * s

    # Free reshape: channel (s1*s + s2)*cp + j and row hh become axes
    # (s1, s2, j*h + hh); the minor dim (w) is untouched.
    x6 = x.reshape(b, s, s, cp * h, w)

    # Stacked 0/1 column-scatter matrix: PK[s2*w + ww, W] = 1 iff W == ww*s + s2.
    k = jnp.arange(s * w)
    widx = jnp.arange(Ws)
    pk = (widx[None, :] == ((k % w) * s + (k // w))[:, None]).astype(x.dtype)

    # Exact passthrough: f32 data needs HIGHEST through the bf16 MXU;
    # bf16 (and narrower) data is already exact with f32 accumulation.
    if x.dtype == jnp.float32:
        precision = jax.lax.Precision.HIGHEST
    else:
        precision = jax.lax.Precision.DEFAULT

    cpt = _pick_channel_tile(cp, h, w, s, x.dtype.itemsize)
    Mt = cpt * h

    itemsize = x.dtype.itemsize
    in_block = s * s * Mt * w * itemsize
    out_block = Mt * s * Ws * itemsize
    pk_bytes = (s * w) * Ws * itemsize
    vmem_limit = max(32 << 20, 2 * (in_block + out_block + pk_bytes) + (8 << 20))
    vmem_limit = int(min(vmem_limit, 64 << 20))

    kernel = functools.partial(_expand_kernel, gain=s, precision=precision)

    out_flat = pl.pallas_call(
        kernel,
        out_shape=jax.ShapeDtypeStruct((b, cp * h, s * Ws), x.dtype),
        grid=(b, cp // cpt),
        in_specs=[
            pl.BlockSpec((1, s, s, Mt, w), lambda ib, jc: (ib, 0, 0, jc, 0)),
            pl.BlockSpec((s * w, Ws), lambda ib, jc: (0, 0)),
        ],
        out_specs=pl.BlockSpec((1, Mt, s * Ws), lambda ib, jc: (ib, jc, 0)),
        compiler_params=pltpu.CompilerParams(
            dimension_semantics=("parallel", "parallel"),
            vmem_limit_bytes=vmem_limit),
    )(x6, pk)

    # Free reshape: row (j*h + hh) and column (s1*Ws + W) collapse exactly to
    # out[b, j, hh*s + s1, W] — the PyTorch permute+view result.
    return out_flat.reshape(b, cp, Hs, Ws)


def expand_ref(x, gain=2):
    """Pure-JAX reference with the exact PyTorch semantics."""
    b, c, h, w = x.shape
    s = gain
    cp = c // (s * s)
    y = x.reshape(b, s, s, cp, h, w)
    y = jnp.transpose(y, (0, 3, 4, 1, 5, 2))
    return y.reshape(b, cp, h * s, w * s)


if __name__ == "__main__":
    key = jax.random.PRNGKey(0)
    b, c, h, w = 2, 8, 16, 16          # small NCHW input, c divisible by gain**2
    gain = 2
    x = jax.random.normal(key, (b, c, h, w), dtype=jnp.float32)

    out = expand_pallas(x, gain=gain)
    out = jax.block_until_ready(out)

    ref = expand_ref(x, gain=gain)
    assert out.shape == ref.shape == (b, c // gain**2, h * gain, w * gain), out.shape
    assert out.dtype == x.dtype
    assert jnp.allclose(out, ref, rtol=1e-5, atol=1e-5), "mismatch vs reference"
    print("KERNEL_OK")
</pallas_src>

<mosaic_0001>
module attributes {stable_mosaic.version = 11 : i64} {
  func.func @_expand_kernel(%arg0: i32, %arg1: i32, %arg2: memref<1x2x2x32x16xf32, #tpu.memory_space<vmem>>, %arg3: memref<32x32xf32, #tpu.memory_space<vmem>>, %arg4: memref<1x32x64xf32, #tpu.memory_space<vmem>>) attributes {dimension_semantics = [#tpu.dimension_semantics<parallel>, #tpu.dimension_semantics<parallel>], iteration_bounds = array<i64: 2, 1>, scalar_prefetch = 0 : i64, scratch_operands = 0 : i64, tpu.core_type = #tpu.core_type<tc>, window_params = [{transform_indices = @transform_0, window_bounds = array<i64: 1, 2, 2, 32, 16>}, {pipeline_mode = #tpu.pipeline_mode<synchronous>, transform_indices = @transform_1, window_bounds = array<i64: 32, 32>}, {transform_indices = @transform_2, window_bounds = array<i64: 1, 32, 64>}]} {
    %c0 = arith.constant 0 : index
    %c0_0 = arith.constant 0 : index
    %0 = vector.load %arg3[%c0, %c0_0] : memref<32x32xf32, #tpu.memory_space<vmem>>, vector<32x32xf32>
    %c0_1 = arith.constant 0 : index
    %c0_2 = arith.constant 0 : index
    %c0_3 = arith.constant 0 : index
    %c0_4 = arith.constant 0 : index
    %c0_5 = arith.constant 0 : index
    %1 = vector.load %arg2[%c0_1, %c0_2, %c0_3, %c0_4, %c0_5] : memref<1x2x2x32x16xf32, #tpu.memory_space<vmem>>, vector<1x1x1x32x16xf32>
    %2 = vector.shape_cast %1 : vector<1x1x1x32x16xf32> to vector<32x16xf32>
    %c0_6 = arith.constant 0 : index
    %c0_7 = arith.constant 0 : index
    %c1 = arith.constant 1 : index
    %c0_8 = arith.constant 0 : index
    %c0_9 = arith.constant 0 : index
    %3 = vector.load %arg2[%c0_6, %c0_7, %c1, %c0_8, %c0_9] : memref<1x2x2x32x16xf32, #tpu.memory_space<vmem>>, vector<1x1x1x32x16xf32>
    %4 = vector.shape_cast %3 : vector<1x1x1x32x16xf32> to vector<32x16xf32>
    %5 = tpu.concatenate %2, %4 in 1 : vector<32x16xf32>, vector<32x16xf32> -> vector<32x32xf32>
    %cst = arith.constant dense<0.000000e+00> : vector<32x32xf32>
    %6 = tpu.matmul %5, %0, %cst {dimension_numbers = #tpu.dot_dimension_numbers<[1], [0], [0], [1], [0, 0, 1, 1], [], []>, precision = #tpu.contract_precision<fp32>} : vector<32x32xf32>, vector<32x32xf32>, vector<32x32xf32> -> vector<32x32xf32>
    %c0_10 = arith.constant 0 : index
    %c1_11 = arith.constant 1 : index
    %c0_12 = arith.constant 0 : index
    %c0_13 = arith.constant 0 : index
    %c0_14 = arith.constant 0 : index
    %7 = vector.load %arg2[%c0_10, %c1_11, %c0_12, %c0_13, %c0_14] : memref<1x2x2x32x16xf32, #tpu.memory_space<vmem>>, vector<1x1x1x32x16xf32>
    %8 = vector.shape_cast %7 : vector<1x1x1x32x16xf32> to vector<32x16xf32>
    %c0_15 = arith.constant 0 : index
    %c1_16 = arith.constant 1 : index
    %c1_17 = arith.constant 1 : index
    %c0_18 = arith.constant 0 : index
    %c0_19 = arith.constant 0 : index
    %9 = vector.load %arg2[%c0_15, %c1_16, %c1_17, %c0_18, %c0_19] : memref<1x2x2x32x16xf32, #tpu.memory_space<vmem>>, vector<1x1x1x32x16xf32>
    %10 = vector.shape_cast %9 : vector<1x1x1x32x16xf32> to vector<32x16xf32>
    %11 = tpu.concatenate %8, %10 in 1 : vector<32x16xf32>, vector<32x16xf32> -> vector<32x32xf32>
    %cst_20 = arith.constant dense<0.000000e+00> : vector<32x32xf32>
    %12 = tpu.matmul %11, %0, %cst_20 {dimension_numbers = #tpu.dot_dimension_numbers<[1], [0], [0], [1], [0, 0, 1, 1], [], []>, precision = #tpu.contract_precision<fp32>} : vector<32x32xf32>, vector<32x32xf32>, vector<32x32xf32> -> vector<32x32xf32>
    %13 = tpu.concatenate %6, %12 in 1 : vector<32x32xf32>, vector<32x32xf32> -> vector<32x64xf32>
    %c0_21 = arith.constant 0 : index
    %c0_22 = arith.constant 0 : index
    %c0_23 = arith.constant 0 : index
    %14 = vector.load %arg4[%c0_21, %c0_22, %c0_23] : memref<1x32x64xf32, #tpu.memory_space<vmem>>, vector<1x32x64xf32>
    %15 = vector.shape_cast %14 : vector<1x32x64xf32> to vector<32x64xf32>
    %16 = vector.shape_cast %13 : vector<32x64xf32> to vector<1x32x64xf32>
    tpu.vector_store %arg4[%c0_21, %c0_22, %c0_23], %16 {strides = array<i32>} : memref<1x32x64xf32, #tpu.memory_space<vmem>>, vector<1x32x64xf32>,
    return
  }
  func.func @transform_0(%arg0: i32, %arg1: i32) -> (i32, i32, i32, i32, i32) {
    %c0_i32 = arith.constant 0 : i32
    %c0_i32_0 = arith.constant 0 : i32
    %c0_i32_1 = arith.constant 0 : i32
    %c0_i32_2 = arith.constant 0 : i32
    return %arg0, %c0_i32, %c0_i32_0, %arg1, %c0_i32_1 : i32, i32, i32, i32, i32
  }
  func.func @transform_1(%arg0: i32, %arg1: i32) -> (i32, i32) {
    %c0_i32 = arith.constant 0 : i32
    %c0_i32_0 = arith.constant 0 : i32
    %c0_i32_1 = arith.constant 0 : i32
    return %c0_i32, %c0_i32_0 : i32, i32
  }
  func.func @transform_2(%arg0: i32, %arg1: i32) -> (i32, i32, i32) {
    %c0_i32 = arith.constant 0 : i32
    %c0_i32_0 = arith.constant 0 : i32
    return %arg0, %arg1, %c0_i32 : i32, i32, i32
  }
}

</mosaic_0001>

<bundles_post_ra>
// kernel: tpu_custom_call.1
= control target key start
LH: loop header
LB: loop body
LE: loop exit
PB: predicated region body
PF: predicated region fallthrough
CT: control target
= control target key end

     0   :  { %7 = vsyncpa [#allocation3], 0  ;;  %s1395_s0 = inlined_call_operand.vmem [shape: f32[2,2,2,32,16], index: 0, kind: input, shape index: {}]   ;;  %s1396_s1 = inlined_call_operand.vmem [shape: f32[32,32], index: 1, kind: input, shape index: {}]   ;;  %s1397_s2 = inlined_call_operand.hbm [shape: f32[2,32,64], index: 2, kind: output, shape index: {}]  }
   0x1   :  { %9 = vsyncpa [#allocation3 + $0x1], 0  ;;  %s1125_s9 = smov 0   ;;  %s1127_s10 = smov 0  }
   0x2   :  { %s1129_s11 = smov 0   ;;  %s1131_s12 = smov 0  }
   0x3   :  { %s1133_s13 = smov 0   ;;  %s1135_s14 = smov 0  }
   0x4 LB: > { %s940_s15 = sadd.s32 4294967295, %s1104_s14   ;;  %s941_s16 = sadd.s32 4294967294, %s1104_s14   ;;  %s1104_s14 = sphi %s1135_s14, %s15_s14   ;;  %s1100_s13 = sphi %s1133_s13, %s1404_s13   ;;  %s1096_s12 = sphi %s1131_s12, %s1403_s12   ;;  %s1092_s11 = sphi %s1129_s11, %s1402_s11   ;;  %s1088_s10 = sphi %s1127_s10, %s1401_s10   ;;  %s1084_s9 = sphi %s1125_s9, %s1400_s9  }
   0x5   : > { %s27_s17 = sadd.s32 1, %s1100_s13  ;;  %s85_s18 = sadd.s32 1, %s1092_s11 }
   0x6   : > { %p29_p0 = scmp.ge.s32.totalorder %s27_s17, 2  ;;  %p95_p1 = scmp.ne.s32.totalorder %s1092_s11, %s1088_s10 }
   0x7   : > { %p96_p2 = scmp.eq.s32.totalorder %s940_s15, 1  ;;  %p101_p3 = scmp.ne.s32.totalorder %s1088_s10, %s1084_s9 }
   0x8   : > { %s1406_s17 = smov (%p29_p0, %s27_s17), 0  ;;  %p102_p5 = scmp.eq.s32.totalorder %s941_s16, 1 }
   0x9   : > { %p1165_p4 = por %p96_p2, %p95_p1  ;;  %s80_s20 = ssub.s32 %s1100_s13, %s1406_s17 }
   0xa   : > { %p944_p6 = scmp.ge.s32.totalorder %s1104_s14, 1  ;;  %p83_p7 = scmp.eq.s32.totalorder %s80_s20, 0 }
   0xb   : > { %p1172_p8 = por %p102_p5, %p101_p3  ;;  %p136_p9 = scmp.lt.s32.totalorder %s1104_s14, 3 }
   0xc   : > { %s1178_s22 = scalar_select %p83_p7, %s1092_s11, %s85_s18  }
   0xd   : > { %p137_p10 = pnand %p944_p6, %p136_p9 }
   0xe   : > { %p163_p11 = scmp.lt.s32.totalorder (!%p137_p10), %s1096_s12, 1  ;;  %s1106_s4 = smov (!%p137_p10), 16  }
   0xf   : > { %140 = sbr.rel (%p137_p10) target bundleno = 487 (0x1e7), region = 28  ;;  %s1107_s15 = smov (!%p137_p10), 32  }
  0x10   : > { %s159_s16 = sand.u32 (!%p137_p10), 1, %s1088_s10   ;;  %s966_s23 = sshll.u32 (!%p137_p10), %s1096_s12, 5 }
  0x11   : > { %s945_s18 = sshll.u32 (!%p137_p10), %s159_s16, 5  ;;  %s857_s26 = scalar_lea.hbm (!%p137_p10), %s1397_s2, %s966_s23 }
  0x12   : > { %s161_s20 = scalar_lea.vmem (!%p137_p10), [#allocation2], %s945_s18  ;;  %s1046_s5 = scalar_lea.hbm (!%p137_p10), %s1397_s2, 64 }
  0x14   : > { %v176_v0 = vld [vmem:[%s1396_s1 + $0x18] sm:$0xff]  ;;  %v175_v1 = vld [vmem:[%s1396_s1 + $0x10] sm:$0xff]  ;;  %s164_s27 = scalar_select %p163_p11, %s1096_s12, 1  ;;  %v174_v20 = vld [vmem:[%s1396_s1 + $0x8] sm:$0xff]  ;;  %vm202_vm0 = vcmask 130048   ;;  %vm207_vm1 = vcmask 261120  }
  0x15   : > { %v1187_v2 = vand.u32 4294901760, %v176_v0  ;;  %v1189_v3 = vand.u32 4294901760, %v175_v1  ;;  %v1230_v21 = vand.u32 4294901760, %v174_v20  ;;  %v173_v22 = vld [vmem:[%s1396_s1] sm:$0xff]  ;;  %vm838_vm2 = vcmask 523264   ;;  %s844_s12 = scalar_lea.sflag [#allocation3], %s159_s16 }
  0x16   : > { %s965_s28 = sshll.u32 %s164_s27, 7  ;;  %v1238_v24 = vand.u32 4294901760, %v173_v22  ;;  %s858_s27 = sshll.u32 %s161_s20, 4  ;;  %s859_s27 = int_to_ptr.vmem [resolvable:$true] %s858_s27 }
  0x17   : > { %v1193_v4 = vsub.f32 %v176_v0, %v1187_v2  ;;  %v1196_v5 = vsub.f32 %v175_v1, %v1189_v3  ;;  %384 = vmatpush.msra.mxu3 %v1187_v2  ;;  %233 = vmatpush.msra.mxu0 %v1187_v2  ;;  %s1203_s3 = scalar_lea.vmem %s1395_s0, %s965_s28  ;;  %v1236_v23 = vsub.f32 %v174_v20, %v1230_v21  ;;  %s860_s28 = sshll.u32 %s857_s26, 4  ;;  %s861_s28 = int_to_ptr.hbm [resolvable:$true] %s860_s28 }
  0x18   : > { %v948_v8 = vld [vmem:[%s1203_s3 + $0x20] sm:$0xff]  ;;  %v950_v9 = vld [vmem:[%s1203_s3 + $0x30] sm:$0xff]  ;;  %v949_v15 = vld [vmem:[%s1203_s3 + $0x28] sm:$0xff]  ;;  %v1246_v26 = vsub.f32 %v173_v22, %v1238_v24  ;;  %s1040_s29 = sshra.s32 %s861_s28, 4  ;;  %s1041_s29 = int_to_ptr.hbm [resolvable:$true] %s1040_s29 }
  0x19   : > { %v1206_v6 = vand.u32 4294901760, %v1193_v4  ;;  %v1209_v7 = vand.u32 4294901760, %v1196_v5  ;;  %340 = vmatpush.msra.mxu2 %v1193_v4  ;;  %386 = vmatpush.msra.mxu3 %v1189_v3  ;;  %v956_v12 = vld [vmem:[%s1203_s3 + $0x60] sm:$0xff]  ;;  %v951_v16 = vld [vmem:[%s1203_s3 + $0x38] sm:$0xff]  ;;  %v957_v17 = vld [vmem:[%s1203_s3 + $0x68] sm:$0xff]  ;;  %v1243_v25 = vand.u32 4294901760, %v1236_v23  ;;  %p1047_p1 = scmp.lt.s32.totalorder %s1041_s29, %s1397_s2 }
  0x1a   : > { %235 = vmatpush.msra.mxu0 %v1189_v3  ;;  %190 = vrot.lane.b32.xlu0 %v948_v8, %s1106_s4  ;;  %v958_v18 = vld [vmem:[%s1203_s3 + $0x70] sm:$0xff]  ;;  %v959_v19 = vld [vmem:[%s1203_s3 + $0x78] sm:$0xff]  ;;  %v1254_v28 = vand.u32 4294901760, %v1246_v26  ;;  %v177_v32 = vld [vmem:[%s1203_s3] sm:$0xff]  ;;  %s1042_s30 = scalar_lea.hbm %s1041_s29, 32 }
  0x1b   : > { %194 = vrot.lane.b32.xlu1 %v950_v9, %s1106_s4  ;;  %v288_v10 = vsub.f32 %v1193_v4, %v1206_v6  ;;  %v294_v11 = vsub.f32 %v1196_v5, %v1209_v7  ;;  %343 = vmatpush.msra.mxu2 %v1196_v5  ;;  %v300_v27 = vsub.f32 %v1236_v23, %v1243_v25  ;;  %v179_v37 = vld [vmem:[%s1203_s3 + $0x10] sm:$0xff]  ;;  %v178_v41 = vld [vmem:[%s1203_s3 + $0x8] sm:$0xff]  ;;  %v180_v50 = vld [vmem:[%s1203_s3 + $0x18] sm:$0xff]  ;;  %p1043_p12 = scmp.ne.s32.totalorder %s1041_s29, %s1042_s30  ;;  %p1048_p2 = scmp.lt.s32.totalorder %s1046_s5, %s1042_s30 }
  0x1c   : > { %512 = vrot.lane.b32.xlu2 %v956_v12, %s1106_s4  ;;  %388 = vmatpush.msra.mxu3 %v1230_v21  ;;  %v306_v30 = vsub.f32 %v1246_v26, %v1254_v28  ;;  %v952_v51 = vld [vmem:[%s1203_s3 + $0x40] sm:$0xff]  ;;  %v953_v0 = vld [vmem:[%s1203_s3 + $0x48] sm:$0xff] }
  0x1d   : > { %v289_v13 = vand.u32 4294901760, %v288_v10  ;;  %v295_v14 = vand.u32 4294901760, %v294_v11  ;;  %237 = vmatpush.msra.mxu0 %v1230_v21  ;;  %346 = vmatpush.msra.mxu2 %v1236_v23  ;;  %v301_v29 = vand.u32 4294901760, %v300_v27  ;;  %v954_v10 = vld [vmem:[%s1203_s3 + $0x50] sm:$0xff]  ;;  %p1044_p13 = pnand %p1043_p12, %p1165_p4  ;;  %p1049_p3 = por %p1048_p2, %p1047_p1 }
  0x1e   : > { %390 = vmatpush.msra.mxu3 %v1238_v24  ;;  %v307_v31 = vand.u32 4294901760, %v306_v30 }
  0x1f   : > { %290 = vmatpush.msra.mxu1 %v289_v13  ;;  %239 = vmatpush.msra.mxu0 %v1238_v24  ;;  %p1045_p0 = pneg %p1044_p13 }
  0x20   : > { %610 = vmatpush.msrb.mxu3 %v289_v13  ;;  %349 = vmatpush.msra.mxu2 %v1246_v26 }
  0x21   : > { %296 = vmatpush.msra.mxu1 %v295_v14  ;;  %431 = vmatpush.msrb.mxu0 %v1206_v6  ;;  %p1050_p5 = pnand %p1049_p3, %p1045_p0 }
  0x22   : > { %192 = vrot.lane.b32.xlu0 %v949_v15, %s1106_s4  ;;  %553 = vmatpush.msrb.mxu2 %v1187_v2 }
  0x23   : > { %196 = vrot.lane.b32.xlu1 %v951_v16, %s1106_s4  ;;  %616 = vmatpush.msrb.mxu3 %v295_v14 }
  0x24   : > { %514 = vrot.lane.b32.xlu2 %v957_v17, %s1106_s4  ;;  %435 = vmatpush.msrb.mxu0 %v1209_v7 }
  0x25   : > { %555 = vmatpush.msrb.mxu2 %v1189_v3  ;;  %302 = vmatpush.msra.mxu1 %v301_v29 }
  0x26   : > { %439 = vmatpush.msrb.mxu0 %v1243_v25  ;;  %622 = vmatpush.msrb.mxu3 %v301_v29 }
  0x27   : > { %557 = vmatpush.msrb.mxu2 %v1230_v21  ;;  %308 = vmatpush.msra.mxu1 %v307_v31 }
  0x28   : > { %443 = vmatpush.msrb.mxu0 %v1254_v28  ;;  %628 = vmatpush.msrb.mxu3 %v307_v31 }
  0x29   : > { %474 = vmatpush.msrb.mxu1 %v1187_v2  ;;  %559 = vmatpush.msrb.mxu2 %v1238_v24 }
  0x2a   : > { %516 = vrot.lane.b32.xlu0 %v958_v18, %s1106_s4 }
  0x2b   : > { %518 = vrot.lane.b32.xlu1 %v959_v19, %s1106_s4  ;;  %476 = vmatpush.msrb.mxu1 %v1189_v3 }
  0x2d   : > { %478 = vmatpush.msrb.mxu1 %v1230_v21 }
  0x2f   : > { %480 = vmatpush.msrb.mxu1 %v1238_v24 }
  0x76   : > { %v513_v45 = vpop.permute.xlu2 %512 }
  0x77   : > { %v524_v57 = vsel %vm202_vm0, %v952_v51, %v513_v45 }
  0x78   : > { %v529_v61 = vsel %vm207_vm1, %v524_v57, 0 }
  0x7e   : > { %v515_v63 = vpop.permute.xlu2 %514 }
  0x8c   : > { %v191_v33 = vpop.permute.xlu0 %190 }
  0x8d   : > { %v195_v34 = vpop.permute.xlu1 %194  ;;  %v203_v35 = vsel %vm202_vm0, %v177_v32, %v191_v33 }
  0x8e   : > { %v209_v36 = vsel %vm207_vm1, %v203_v35, 0  ;;  %v205_v40 = vsel %vm202_vm0, %v179_v37, %v195_v34 }
  0x8f   : > { %v1275_v38 = vand.u32 4294901760, %v209_v36  ;;  %v215_v44 = vsel %vm207_vm1, %v205_v40, 0 }
  0x90   : > { %v1293_v53 = vand.u32 4294901760, %v215_v44 }
  0x91   : > { %v241_v39 = vsub.f32 %v209_v36, %v1275_v38  ;;  %310 = vmatmul.f32.vlgmr.msra.gmra.mxu1 %v1275_v38 }
  0x92   : > { %704 = vmatpush.msra.mxu1 %v1187_v2  ;;  %v257_v58 = vsub.f32 %v215_v44, %v1293_v53 }
  0x93   : > { %352 = vmatmul.f32.vlgmr.msra.gmra.mxu2 %v241_v39  ;;  %v242_v42 = vand.u32 4294901760, %v241_v39 }
  0x94   : > { %v193_v43 = vpop.permute.xlu0 %192  ;;  %751 = vmatpush.msra.mxu2 %v1206_v6  ;;  %706 = vmatpush.msra.mxu1 %v1189_v3 }
  0x95   : > { %v204_v46 = vsel %vm202_vm0, %v178_v41, %v193_v43  ;;  %394 = vmatmul.f32.vlgmr.msra.gmra.mxu3 %v242_v42  ;;  %v243_v47 = vsub.f32 %v241_v39, %v242_v42  ;;  %v197_v49 = vpop.permute.xlu1 %196 }
  0x96   : > { %v212_v48 = vsel %vm207_vm1, %v204_v46, 0  ;;  %794 = vmatpush.msra.mxu3 %v1187_v2  ;;  %755 = vmatpush.msra.mxu2 %v1209_v7  ;;  %v206_v56 = vsel %vm202_vm0, %v180_v50, %v197_v49 }
  0x97   : > { %v1291_v52 = vand.u32 4294901760, %v212_v48  ;;  %v244_v54 = vand.u32 4294901760, %v243_v47  ;;  %708 = vmatpush.msra.mxu1 %v1230_v21  ;;  %v218_v60 = vsel %vm207_vm1, %v206_v56, 0 }
  0x98   : > { %796 = vmatpush.msra.mxu3 %v1189_v3  ;;  %759 = vmatpush.msra.mxu2 %v1243_v25  ;;  %v1313_v1 = vand.u32 4294901760, %v218_v60  ;;  %v258_v3 = vand.u32 4294901760, %v257_v58 }
  0x99   : > { %v249_v55 = vsub.f32 %v212_v48, %v1291_v52  ;;  %245 = vmatmul.f32.vlgmr.msra.gmra.mxu0 %v244_v54  ;;  %314 = vmatmul.f32.gmra.mxu1 %v1291_v52 }
  0x9a   : > { %660 = vmatpush.msra.mxu0 %v1193_v4  ;;  %798 = vmatpush.msra.mxu3 %v1230_v21  ;;  %v1315_v4 = vand.u32 4294901760, %v529_v61  ;;  %v265_v6 = vsub.f32 %v218_v60, %v1313_v1  ;;  %v259_v8 = vsub.f32 %v257_v58, %v258_v3  ;;  %v955_v21 = vld [vmem:[%s1203_s3 + $0x58] sm:$0xff] }
  0x9b   : > { %357 = vmatmul.f32.gmra.mxu2 %v249_v55  ;;  %v250_v59 = vand.u32 4294901760, %v249_v55  ;;  %710 = vmatpush.msra.mxu1 %v1238_v24 }
  0x9c   : > { %663 = vmatpush.msra.mxu0 %v1196_v5  ;;  %763 = vmatpush.msra.mxu2 %v1254_v28  ;;  %v525_v5 = vsel %vm202_vm0, %v953_v0, %v515_v63  ;;  %v561_v7 = vsub.f32 %v529_v61, %v1315_v4  ;;  %v517_v11 = vpop.permute.xlu0 %516  ;;  %v260_v12 = vand.u32 4294901760, %v259_v8  ;;  %v266_v13 = vand.u32 4294901760, %v265_v6 }
  0x9d   : > { %400 = vmatmul.f32.gmra.mxu3 %v250_v59  ;;  %v251_v62 = vsub.f32 %v249_v55, %v250_v59  ;;  %v532_v9 = vsel %vm207_vm1, %v525_v5, 0  ;;  %v526_v16 = vsel %vm202_vm0, %v954_v10, %v517_v11  ;;  %v519_v22 = vpop.permute.xlu1 %518 }
  0x9e   : > { %666 = vmatpush.msra.mxu0 %v1236_v23  ;;  %800 = vmatpush.msra.mxu3 %v1238_v24  ;;  %v568_v14 = vand.u32 4294901760, %v532_v9  ;;  %v562_v15 = vand.u32 4294901760, %v561_v7  ;;  %v267_v18 = vsub.f32 %v265_v6, %v266_v13  ;;  %v535_v20 = vsel %vm207_vm1, %v526_v16, 0 }
  0x9f   : > { %v252_v2 = vand.u32 4294901760, %v251_v62  ;;  %v576_v25 = vand.u32 4294901760, %v535_v20  ;;  %v527_v27 = vsel %vm202_vm0, %v955_v21, %v519_v22 }
  0xa0   : > { %669 = vmatpush.msra.mxu0 %v1246_v26  ;;  %v569_v17 = vsub.f32 %v532_v9, %v568_v14  ;;  %v563_v19 = vsub.f32 %v561_v7, %v562_v15  ;;  %v268_v23 = vand.u32 4294901760, %v267_v18  ;;  %v538_v30 = vsel %vm207_vm1, %v527_v27, 0 }
  0xa1   : > { %253 = vmatmul.f32.gmra.mxu0 %v252_v2  ;;  %318 = vmatmul.f32.gmra.mxu1 %v1293_v53  ;;  %v577_v28 = vsub.f32 %v535_v20, %v576_v25  ;;  %v584_v32 = vand.u32 4294901760, %v538_v30 }
  0xa2   : > { %v564_v24 = vand.u32 4294901760, %v563_v19  ;;  %v570_v26 = vand.u32 4294901760, %v569_v17 }
  0xa3   : > { %362 = vmatmul.f32.gmra.mxu2 %v257_v58  ;;  %v578_v33 = vand.u32 4294901760, %v577_v28  ;;  %v585_v34 = vsub.f32 %v538_v30, %v584_v32 }
  0xa4   : > { %v571_v29 = vsub.f32 %v569_v17, %v570_v26 }
  0xa5   : > { %406 = vmatmul.f32.gmra.mxu3 %v258_v3  ;;  %v579_v35 = vsub.f32 %v577_v28, %v578_v33  ;;  %v586_v37 = vand.u32 4294901760, %v585_v34 }
  0xa6   : > { %v572_v31 = vand.u32 4294901760, %v571_v29 }
  0xa7   : > { %v580_v36 = vand.u32 4294901760, %v579_v35  ;;  %v587_v39 = vsub.f32 %v585_v34, %v586_v37 }
  0xa9   : > { %261 = vmatmul.f32.gmra.mxu0 %v260_v12  ;;  %322 = vmatmul.f32.gmra.mxu1 %v1313_v1  ;;  %v588_v40 = vand.u32 4294901760, %v587_v39 }
  0xab   : > { %367 = vmatmul.f32.gmra.mxu2 %v265_v6 }
  0xad   : > { %412 = vmatmul.f32.gmra.mxu3 %v266_v13 }
  0xb1   : > { %269 = vmatmul.f32.gmra.mxu0 %v268_v23  ;;  %482 = vmatmul.f32.vlgmr.msrb.gmra.mxu1 %v1275_v38 }
  0xb3   : > { %565 = vmatmul.f32.vlgmr.msrb.gmra.mxu2 %v564_v24 }
  0xb5   : > { %630 = vmatmul.f32.vlgmr.msrb.gmra.mxu3 %v1315_v4 }
  0xb9   : > { %445 = vmatmul.f32.vlgmr.msrb.gmra.mxu0 %v1275_v38  ;;  %486 = vmatmul.f32.gmra.mxu1 %v1291_v52 }
  0xbb   : > { %573 = vmatmul.f32.gmra.mxu2 %v572_v31 }
  0xbd   : > { %634 = vmatmul.f32.gmra.mxu3 %v568_v14 }
  0xc1   : > { %449 = vmatmul.f32.gmra.mxu0 %v1291_v52  ;;  %490 = vmatmul.f32.gmra.mxu1 %v1293_v53 }
  0xc3   : > { %581 = vmatmul.f32.gmra.mxu2 %v580_v36 }
  0xc5   : > { %638 = vmatmul.f32.gmra.mxu3 %v576_v25 }
  0xc9   : > { %453 = vmatmul.f32.gmra.mxu0 %v1293_v53  ;;  %494 = vmatmul.f32.gmra.mxu1 %v1313_v1 }
  0xcb   : > { %589 = vmatmul.f32.gmra.mxu2 %v588_v40 }
  0xcd   : > { %642 = vmatmul.f32.gmra.mxu3 %v584_v32 }
  0xd1   : > { %457 = vmatmul.f32.gmra.mxu0 %v1313_v1  ;;  %714 = vmatmul.f32.vlgmr.msra.gmra.mxu1 %v562_v15 }
  0xd3   : > { %765 = vmatmul.f32.vlgmr.msra.gmra.mxu2 %v1315_v4 }
  0xd5   : > { %802 = vmatmul.f32.vlgmr.msra.gmra.mxu3 %v1315_v4 }
  0xd9   : > { %672 = vmatmul.f32.vlgmr.msra.gmra.mxu0 %v561_v7  ;;  %720 = vmatmul.f32.gmra.mxu1 %v570_v26 }
  0xdb   : > { %769 = vmatmul.f32.gmra.mxu2 %v568_v14 }
  0xdd   : > { %806 = vmatmul.f32.gmra.mxu3 %v568_v14 }
  0xe1   : > { %677 = vmatmul.f32.gmra.mxu0 %v569_v17  ;;  %726 = vmatmul.f32.gmra.mxu1 %v578_v33 }
  0xe3   : > { %773 = vmatmul.f32.gmra.mxu2 %v576_v25 }
  0xe5   : > { %810 = vmatmul.f32.gmra.mxu3 %v576_v25 }
  0xe9   : > { %682 = vmatmul.f32.gmra.mxu0 %v577_v28  ;;  %732 = vmatmul.f32.gmra.mxu1 %v586_v37 }
  0xeb   : > { %777 = vmatmul.f32.gmra.mxu2 %v584_v32 }
  0xed   : > { %814 = vmatmul.f32.gmra.mxu3 %v584_v32 }
  0xf1   : > { %687 = vmatmul.f32.gmra.mxu0 %v585_v34 }
 0x10e   : > { %v311_v38 = vpop.f32.mrf.mxu1 }
 0x116   : > { %v246_v41 = vpop.f32.mrf.mxu0  ;;  %v315_v42 = vpop.f32.mrf.mxu1 }
 0x117   : > { %v312_v43 = vadd.f32 %v311_v38, %v246_v41  ;;  %v353_v44 = vpop.f32.mrf.mxu2 }
 0x118   : > { %v395_v45 = vpop.f32.mrf.mxu3 }
 0x119   : > { %v354_v46 = vadd.f32 %v353_v44, %v312_v43 }
 0x11b   : > { %v396_v47 = vadd.f32 %v395_v45, %v354_v46 }
 0x11e   : > { %v254_v48 = vpop.f32.mrf.mxu0  ;;  %v319_v49 = vpop.f32.mrf.mxu1 }
 0x11f   : > { %v316_v50 = vadd.f32 %v315_v42, %v254_v48  ;;  %v358_v51 = vpop.f32.mrf.mxu2 }
 0x120   : > { %v401_v52 = vpop.f32.mrf.mxu3 }
 0x121   : > { %v359_v53 = vadd.f32 %v358_v51, %v316_v50 }
 0x123   : > { %v402_v54 = vadd.f32 %v401_v52, %v359_v53 }
 0x126   : > { %v262_v55 = vpop.f32.mrf.mxu0  ;;  %v323_v56 = vpop.f32.mrf.mxu1 }
 0x127   : > { %v320_v57 = vadd.f32 %v319_v49, %v262_v55  ;;  %v363_v58 = vpop.f32.mrf.mxu2 }
 0x128   : > { %v407_v59 = vpop.f32.mrf.mxu3 }
 0x129   : > { %v364_v60 = vadd.f32 %v363_v58, %v320_v57 }
 0x12b   : > { %v408_v61 = vadd.f32 %v407_v59, %v364_v60 }
 0x12e   : > { %v270_v62 = vpop.f32.mrf.mxu0  ;;  %v483_v63 = vpop.f32.mrf.mxu1 }
 0x12f   : > { %v324_v0 = vadd.f32 %v323_v56, %v270_v62  ;;  %v368_v1 = vpop.f32.mrf.mxu2 }
 0x130   : > { %v413_v2 = vpop.f32.mrf.mxu3 }
 0x131   : > { %v369_v3 = vadd.f32 %v368_v1, %v324_v0 }
 0x133   : > { %v414_v4 = vadd.f32 %v413_v2, %v369_v3 }
 0x136   : > { %v446_v5 = vpop.f32.mrf.mxu0  ;;  %v487_v6 = vpop.f32.mrf.mxu1 }
 0x137   : > { %v447_v7 = vadd.f32 %v446_v5, %v396_v47  ;;  %v566_v8 = vpop.f32.mrf.mxu2 }
 0x138   : > { %v631_v9 = vpop.f32.mrf.mxu3 }
 0x139   : > { %v1341_v10 = vadd.f32 %v483_v63, %v447_v7  ;;  %v632_v29 = vadd.f32 %v631_v9, %v566_v8 }
 0x13e   : > { %v450_v11 = vpop.f32.mrf.mxu0  ;;  %v491_v12 = vpop.f32.mrf.mxu1 }
 0x13f   : > { %v451_v13 = vadd.f32 %v450_v11, %v402_v54  ;;  %v574_v14 = vpop.f32.mrf.mxu2 }
 0x140   : > { %v635_v15 = vpop.f32.mrf.mxu3 }
 0x141   : > { %v1343_v16 = vadd.f32 %v487_v6, %v451_v13  ;;  %v636_v37 = vadd.f32 %v635_v15, %v574_v14 }
 0x146   : > { %v454_v17 = vpop.f32.mrf.mxu0  ;;  %v495_v20 = vpop.f32.mrf.mxu1 }
 0x147   : > { %v455_v18 = vadd.f32 %v454_v17, %v408_v61  ;;  %v582_v19 = vpop.f32.mrf.mxu2 }
 0x148   : > { %v639_v21 = vpop.f32.mrf.mxu3 }
 0x149   : > { %v1345_v22 = vadd.f32 %v491_v12, %v455_v18  ;;  %v640_v45 = vadd.f32 %v639_v21, %v582_v19 }
 0x14e   : > { %v458_v23 = vpop.f32.mrf.mxu0  ;;  %v715_v28 = vpop.f32.mrf.mxu1 }
 0x14f   : > { %v459_v24 = vadd.f32 %v458_v23, %v414_v4  ;;  %v590_v25 = vpop.f32.mrf.mxu2 }
 0x150   : > { %v643_v26 = vpop.f32.mrf.mxu3 }
 0x151   : > { %v496_v27 = vadd.f32 %v495_v20, %v459_v24  ;;  %v644_v54 = vadd.f32 %v643_v26, %v590_v25 }
 0x156   : > { %v673_v30 = vpop.f32.mrf.mxu0  ;;  %v721_v36 = vpop.f32.mrf.mxu1 }
 0x157   : > { %v674_v31 = vadd.f32 %v673_v30, %v632_v29  ;;  %v766_v32 = vpop.f32.mrf.mxu2 }
 0x158   : > { %v803_v33 = vpop.f32.mrf.mxu3 }
 0x159   : > { %v716_v34 = vadd.f32 %v715_v28, %v674_v31 }
 0x15b   : > { %v767_v35 = vadd.f32 %v766_v32, %v716_v34 }
 0x15d   : > { %v804_v39 = vadd.f32 %v803_v33, %v767_v35 }
 0x15e   : > { %v678_v40 = vpop.f32.mrf.mxu0  ;;  %v727_v47 = vpop.f32.mrf.mxu1 }
 0x15f   : > { %v679_v38 = vadd.f32 %v678_v40, %v636_v37  ;;  %v770_v41 = vpop.f32.mrf.mxu2  ;;  %822 = vrot.lane.b32.xlu2 %v804_v39, %s1107_s15 }
 0x160   : > { %v807_v42 = vpop.f32.mrf.mxu3 }
 0x161   : > { %v722_v43 = vadd.f32 %v721_v36, %v679_v38 }
 0x163   : > { %v771_v44 = vadd.f32 %v770_v41, %v722_v43 }
 0x165   : > { %v808_v46 = vadd.f32 %v807_v42, %v771_v44 }
 0x166   : > { %v683_v48 = vpop.f32.mrf.mxu0  ;;  %v733_v58 = vpop.f32.mrf.mxu1 }
 0x167   : > { %v684_v49 = vadd.f32 %v683_v48, %v640_v45  ;;  %824 = vrot.lane.b32.xlu0 %v808_v46, %s1107_s15  ;;  %v774_v50 = vpop.f32.mrf.mxu2 }
 0x168   : > { %v811_v52 = vpop.f32.mrf.mxu3 }
 0x169   : > { %v728_v51 = vadd.f32 %v727_v47, %v684_v49 }
 0x16b   : > { %v775_v53 = vadd.f32 %v774_v50, %v728_v51 }
 0x16d   : > { %v812_v55 = vadd.f32 %v811_v52, %v775_v53 }
 0x16e   : > { %v688_v56 = vpop.f32.mrf.mxu0 }
 0x16f   : > { %v689_v57 = vadd.f32 %v688_v56, %v644_v54  ;;  %826 = vrot.lane.b32.xlu1 %v812_v55, %s1107_s15  ;;  %v778_v60 = vpop.f32.mrf.mxu2 }
 0x170   : > { %v815_v62 = vpop.f32.mrf.mxu3 }
 0x171   : > { %v734_v59 = vadd.f32 %v733_v58, %v689_v57 }
 0x173   : > { %v779_v61 = vadd.f32 %v778_v60, %v734_v59 }
 0x175   : > { %v816_v63 = vadd.f32 %v815_v62, %v779_v61 }
 0x177   : > { %828 = vrot.lane.b32.xlu2 %v816_v63, %s1107_s15 }
 0x1b9   : > { %v823_v0 = vpop.permute.xlu2 %822 }
 0x1ba   : > { %v834_v1 = vsel %vm207_vm1, %v1341_v10, %v823_v0 }
 0x1bb   : > { %839 = vst.msk [vmem:[%s161_s20] sm:$0xff] %vm838_vm2, %v834_v1 }
 0x1d1   : > { %v829_v2 = vpop.permute.xlu2 %828 }
 0x1d2   : > { %v837_v3 = vsel %vm207_vm1, %v496_v27, %v829_v2 }
 0x1d3   : > { %842 = vst.msk [vmem:[%s161_s20 + $0x18] sm:$0xff] %vm838_vm2, %v837_v3 }
 0x1d9   : > { %v825_v4 = vpop.permute.xlu0 %824 }
 0x1da   : > { %v835_v5 = vsel %vm207_vm1, %v1343_v16, %v825_v4 }
 0x1db   : > { %840 = vst.msk [vmem:[%s161_s20 + $0x8] sm:$0xff] %vm838_vm2, %v835_v5 }
 0x1e1   : > { %v827_v6 = vpop.permute.xlu1 %826 }
 0x1e2   : > { %v836_v7 = vsel %vm207_vm1, %v1345_v22, %v827_v6 }
 0x1e3   : > { %841 = vst.msk [vmem:[%s161_s20 + $0x10] sm:$0xff] %vm838_vm2, %v836_v7 }
 0x1e4   : > { %1053 = shalt.err (!%p1050_p5)
}
 0x1e5   : > { %s1108_s8 = smov 128   ;;  %s1109_s15 = smov 8  }
 0x1e6   : > { %967 = dma.vmem_to_hbm [thread:$0]  (%p1165_p4), %s859_s27, 512, %s861_s28, %s844_s12, %s1108_s8, %s1108_s8, %s1109_s15  }
 0x1e7 PF: > { %p973_p6 = scmp.ge.s32.totalorder %s1104_s14, 2  ;;  %s875_s16 = sand.u32 1, %s1084_s9  }
 0x1e8   : > { %s876_s18 = scalar_lea.sflag [#allocation3], %s875_s16 }
 0x1e9   : > { %p970_p7 = pnand %p973_p6, %p1172_p8 }
 0x1eb   : > { %p971_p9 = pneg %p970_p7 }
 0x1ed   : > { %1079 = dma.done.wait (%p971_p9), %s876_s18, 512  }
 0x1ee   : > { %1081 = vsyncadd (%p971_p9), %s876_s18, 4294966784  ;;  %s15_s14 = sadd.s32 1, %s1104_s14   ;;  %s1400_s9 = smov %s1088_s10 }
 0x1ef   : > { %p12_p10 = scmp.ge.s32.totalorder %s15_s14, 4   ;;  %s1401_s10 = smov %s1092_s11 }
 0x1f0   : > { %s1402_s11 = smov %s1178_s22  ;;  %s1403_s12 = smov %s1100_s13 }
 0x1f1   : > { %s1404_s13 = smov %s1406_s17  ;;  %14 = sbr.rel (!%p12_p10) target bundleno = 4 (0x4), region = 66 }
 0x1f6   :  { %882 = vsyncpa [#allocation3], 1 }
 0x1f7   :  { %884 = vsyncpa [#allocation3 + $0x1], 1 }

</bundles_post_ra>
